<compile_context>
chip_gen: v5e
topology: v5e:2x2
jax: 0.10.0
libtpu: 0.0.40
codegen_flags: <defaults>
</compile_context>

<pallas_src>
import math

import jax
import jax.numpy as jnp
from jax import lax
from jax.experimental import pallas as pl
from jax.experimental.pallas import tpu as pltpu


# ----------------------------- config ---------------------------------------
B = 2          # batch
S = 8          # seq_len
DIM = 32       # model dim
H = 4          # n_heads
KV = 2         # n_kv_heads
HD = DIM // H  # head_dim = 8
N_REP = H // KV
SCALE = 1.0 / math.sqrt(HD)

QK_W = (H + KV) * HD        # 48: q heads (32) + kv heads (16), rotary applied
V_W = KV * HD               # 16: v heads
QKV_W = QK_W + V_W          # 64
W_TOT = QKV_W + QK_W        # 112: plus pre-rotated (rotate_half) q|k block
BS = B * S                  # 16: rows of the fused matmul
HBS = H * BS                # 64: head-stacked rows


# ----------------------------- kernel ---------------------------------------
def attention_kernel(x_ref, wqkv_ref, wo_ref, cos_ref, sin_ref, mask_ref, o_ref):
    """Single invocation: whole (B*S) slab, all heads, one store."""
    # fused projection: (16,32)@(32,112) -> [q|k | v | rotate_half(q|k)]
    xqkv = jnp.dot(x_ref[...], wqkv_ref[...],
                   preferred_element_type=jnp.float32)               # (BS, 112)

    # rotary via pre-rotated weight block: two contiguous FMAs, no shuffles.
    # (1/sqrt(HD) already folded into the q columns.)
    qk = (xqkv[:, :QK_W] * cos_ref[...]
          + xqkv[:, QKV_W:QKV_W + QK_W] * sin_ref[...])              # (BS, 48)

    # head-stacked Q/K/V, rows ordered (head, batch, seq); GQA repeat = reuse slice
    k_heads = [qk[:, (H + g) * HD:(H + g + 1) * HD] for g in range(KV)]
    v_heads = [xqkv[:, QK_W + g * HD:QK_W + (g + 1) * HD] for g in range(KV)]
    q_stack = jnp.concatenate(
        [qk[:, h * HD:(h + 1) * HD] for h in range(H)], axis=0)      # (64, HD)
    k_stack = jnp.concatenate(
        [k_heads[h // N_REP] for h in range(H)], axis=0)             # (64, HD)
    v_stack = jnp.concatenate(
        [v_heads[h // N_REP] for h in range(H)], axis=0)             # (64, HD)

    # ONE scores matmul + ONE masked softmax for all heads/batches
    sc = lax.dot_general(q_stack, k_stack, (((1,), (1,)), ((), ())),
                         preferred_element_type=jnp.float32)         # (64, 64)
    sc = sc + mask_ref[...]          # causal + block-diagonal(head,batch) mask
    m = jnp.max(sc, axis=-1, keepdims=True)
    e = jnp.exp(sc - m)
    p = e * pl.reciprocal(jnp.sum(e, axis=-1, keepdims=True), approx=True)

    out_stack = jnp.dot(p, v_stack,
                        preferred_element_type=jnp.float32)          # (64, HD)

    # relayout (head, batch*seq, HD) -> (batch*seq, head*HD)
    attn = jnp.concatenate(
        [out_stack[h * BS:(h + 1) * BS, :] for h in range(H)], axis=1)  # (16,32)

    # fused output projection, stored exactly once.
    # TODO(synk): last dim 32 (<128) -> masked vst; switch to a lane-dense
    #             output slab only if S/DIM grow (few-cycle nuisance here).
    o_ref[...] = jnp.dot(attn.astype(jnp.bfloat16), wo_ref[...],
                         preferred_element_type=jnp.float32)         # (16, 32)


def attention_forward(x2d, wqkv, wo, cos_bs, sin_bs, mask):
    """x2d: (B*S, DIM) bf16; wqkv: (DIM, W_TOT) bf16; wo: (H*HD, DIM) bf16;
    cos_bs/sin_bs: (B*S, QK_W) f32; mask: (HBS, HBS) f32 additive."""
    return pl.pallas_call(
        attention_kernel,
        out_shape=jax.ShapeDtypeStruct((BS, DIM), jnp.float32),
        grid=(1,),
        in_specs=[
            pl.BlockSpec((BS, DIM), lambda i: (0, 0)),       # x (all batches)
            pl.BlockSpec((DIM, W_TOT), lambda i: (0, 0)),    # fused W (resident)
            pl.BlockSpec((H * HD, DIM), lambda i: (0, 0)),   # Wo (resident)
            pl.BlockSpec((BS, QK_W), lambda i: (0, 0)),      # cos (resident)
            pl.BlockSpec((BS, QK_W), lambda i: (0, 0)),      # sin (resident)
            pl.BlockSpec((HBS, HBS), lambda i: (0, 0)),      # additive mask
        ],
        out_specs=pl.BlockSpec((BS, DIM), lambda i: (0, 0)),
    )(x2d, wqkv, wo, cos_bs, sin_bs, mask)


# ----------------------- pure-JAX reference (interleaved rotary) ------------
def reference(x, wq_t, wk_t, wv_t, wo_t, cos, sin):
    q = x @ wq_t            # (B,S,H*HD)
    k = x @ wk_t            # (B,S,KV*HD)
    v = x @ wv_t
    q = q.reshape(B, S, H, HD)
    k = k.reshape(B, S, KV, HD)
    v = v.reshape(B, S, KV, HD)

    def rope(t):
        tr = t.reshape(*t.shape[:-1], HD // 2, 2)
        re, im = tr[..., 0], tr[..., 1]
        c = cos[None, :, None, :]
        s = sin[None, :, None, :]
        out_re = re * c - im * s
        out_im = re * s + im * c
        return jnp.stack([out_re, out_im], axis=-1).reshape(t.shape)

    q, k = rope(q), rope(k)
    k = jnp.repeat(k, N_REP, axis=2)
    v = jnp.repeat(v, N_REP, axis=2)
    q = q.transpose(0, 2, 1, 3)
    k = k.transpose(0, 2, 1, 3)
    v = v.transpose(0, 2, 1, 3)
    scores = (q @ k.transpose(0, 1, 3, 2)) * SCALE
    mask = jnp.triu(jnp.full((S, S), -jnp.inf, dtype=jnp.float32), 1)
    scores = scores + mask[None, None]
    p = jax.nn.softmax(scores.astype(jnp.float32), axis=-1)
    o = p @ v                                    # (B,H,S,HD)
    o = o.transpose(0, 2, 1, 3).reshape(B, S, H * HD)
    return o @ wo_t


# ----------------------------- main ------------------------------------------
if __name__ == "__main__":
    key = jax.random.PRNGKey(0)
    kx, kq, kk, kv_, ko = jax.random.split(key, 5)

    x = jax.random.normal(kx, (B, S, DIM), dtype=jnp.float32)

    # nn.Linear weights are (out, in); we carry their transposes (in, out).
    wq_t = 0.02 * jax.random.normal(kq, (DIM, H * HD), dtype=jnp.float32)
    wk_t = 0.02 * jax.random.normal(kk, (DIM, KV * HD), dtype=jnp.float32)
    wv_t = 0.02 * jax.random.normal(kv_, (DIM, KV * HD), dtype=jnp.float32)
    wo_t = 0.02 * jax.random.normal(ko, (H * HD, DIM), dtype=jnp.float32)

    # pos_cis (complex exponentials) as cos/sin, shape (S, HD//2)
    freqs = 1.0 / (10000.0 ** (jnp.arange(0, HD, 2, dtype=jnp.float32) / HD))
    angles = jnp.arange(S, dtype=jnp.float32)[:, None] * freqs[None, :]
    cos, sin = jnp.cos(angles), jnp.sin(angles)

    # ---- kernel-side parameter prep (glue, done once in the wrapper) ----
    # de-interleave permutation within each head: [0,2,4,...,1,3,5,...]
    half_perm = jnp.concatenate([jnp.arange(0, HD, 2), jnp.arange(1, HD, 2)])
    perm_q = (jnp.arange(H)[:, None] * HD + half_perm[None, :]).reshape(-1)
    perm_kv = (jnp.arange(KV)[:, None] * HD + half_perm[None, :]).reshape(-1)

    wq_half = wq_t[:, perm_q] * SCALE          # fold 1/sqrt(HD) into Q columns
    wk_half = wk_t[:, perm_kv]
    wqk = jnp.concatenate([wq_half, wk_half], axis=1)            # (DIM, 48)

    def rotate_half_cols(w):
        # column-wise rotate_half per 8-wide head block (half layout)
        w4 = w.reshape(DIM, H + KV, 2, HD // 2)
        return jnp.concatenate([-w4[:, :, 1, :], w4[:, :, 0, :]],
                               axis=2).reshape(DIM, QK_W)

    wqk_rot = rotate_half_cols(wqk)                              # (DIM, 48)
    wqkv = jnp.concatenate([wqk, wv_t, wqk_rot],
                           axis=1).astype(jnp.bfloat16)          # (DIM, 112)
    wo_b = wo_t.astype(jnp.bfloat16)                             # (32, 32)

    cos_head = jnp.concatenate([cos, cos], axis=-1)              # (S, HD)
    sin_head = jnp.concatenate([sin, sin], axis=-1)              # (S, HD)
    cos_bs = jnp.tile(cos_head, (B, H + KV)).astype(jnp.float32)  # (16, 48)
    sin_bs = jnp.tile(sin_head, (B, H + KV)).astype(jnp.float32)  # (16, 48)

    # precomputed additive mask for the head-stacked scores: valid iff same
    # (head,batch) block of S rows AND causal within the block.
    r = jnp.arange(HBS)
    same_blk = (r[:, None] // S) == (r[None, :] // S)
    causal = (r[None, :] % S) <= (r[:, None] % S)
    mask = jnp.where(same_blk & causal, 0.0, -1e30).astype(jnp.float32)

    x2d = x.reshape(BS, DIM).astype(jnp.bfloat16)                # (16, 32)

    out2d = attention_forward(x2d, wqkv, wo_b, cos_bs, sin_bs, mask)
    out = jax.block_until_ready(out2d).reshape(B, S, DIM)

    ref = reference(x, wq_t, wk_t, wv_t, wo_t, cos, sin)
    assert out.shape == (B, S, DIM)
    err = jnp.max(jnp.abs(out - ref))
    # bf16 inputs -> loosened tolerance vs. the f32 reference
    assert jnp.allclose(out, ref, atol=2e-3, rtol=2e-2), f"max abs err {err}"

    print("KERNEL_OK")
</pallas_src>

<mosaic_0001>
module attributes {stable_mosaic.version = 11 : i64} {
  func.func @attention_kernel(%arg0: i32, %arg1: memref<16x32xbf16, #tpu.memory_space<vmem>>, %arg2: memref<32x112xbf16, #tpu.memory_space<vmem>>, %arg3: memref<32x32xbf16, #tpu.memory_space<vmem>>, %arg4: memref<16x48xf32, #tpu.memory_space<vmem>>, %arg5: memref<16x48xf32, #tpu.memory_space<vmem>>, %arg6: memref<64x64xf32, #tpu.memory_space<vmem>>, %arg7: memref<16x32xf32, #tpu.memory_space<vmem>>) attributes {dimension_semantics = [#tpu.dimension_semantics<arbitrary>], iteration_bounds = array<i64: 1>, scalar_prefetch = 0 : i64, scratch_operands = 0 : i64, tpu.core_type = #tpu.core_type<tc>, window_params = [{pipeline_mode = #tpu.pipeline_mode<synchronous>, transform_indices = @transform_0, window_bounds = array<i64: 16, 32>}, {pipeline_mode = #tpu.pipeline_mode<synchronous>, transform_indices = @transform_1, window_bounds = array<i64: 32, 112>}, {pipeline_mode = #tpu.pipeline_mode<synchronous>, transform_indices = @transform_2, window_bounds = array<i64: 32, 32>}, {pipeline_mode = #tpu.pipeline_mode<synchronous>, transform_indices = @transform_3, window_bounds = array<i64: 16, 48>}, {pipeline_mode = #tpu.pipeline_mode<synchronous>, transform_indices = @transform_4, window_bounds = array<i64: 16, 48>}, {pipeline_mode = #tpu.pipeline_mode<synchronous>, transform_indices = @transform_5, window_bounds = array<i64: 64, 64>}, {pipeline_mode = #tpu.pipeline_mode<synchronous>, transform_indices = @transform_6, window_bounds = array<i64: 16, 32>}]} {
    %c0 = arith.constant 0 : index
    %c0_0 = arith.constant 0 : index
    %0 = vector.load %arg1[%c0, %c0_0] : memref<16x32xbf16, #tpu.memory_space<vmem>>, vector<16x32xbf16>
    %c0_1 = arith.constant 0 : index
    %c0_2 = arith.constant 0 : index
    %1 = vector.load %arg2[%c0_1, %c0_2] : memref<32x112xbf16, #tpu.memory_space<vmem>>, vector<32x112xbf16>
    %cst = arith.constant dense<0.000000e+00> : vector<16x112xf32>
    %2 = tpu.matmul %0, %1, %cst {dimension_numbers = #tpu.dot_dimension_numbers<[1], [0], [0], [1], [0, 0, 1, 1], [], []>} : vector<16x32xbf16>, vector<32x112xbf16>, vector<16x112xf32> -> vector<16x112xf32>
    %3 = vector.extract_strided_slice %2 {offsets = [0, 0], sizes = [16, 48], strides = [1, 1]} : vector<16x112xf32> to vector<16x48xf32>
    %c0_3 = arith.constant 0 : index
    %c0_4 = arith.constant 0 : index
    %4 = vector.load %arg4[%c0_3, %c0_4] : memref<16x48xf32, #tpu.memory_space<vmem>>, vector<16x48xf32>
    %5 = arith.mulf %3, %4 : vector<16x48xf32>
    %6 = vector.extract_strided_slice %2 {offsets = [0, 64], sizes = [16, 48], strides = [1, 1]} : vector<16x112xf32> to vector<16x48xf32>
    %c0_5 = arith.constant 0 : index
    %c0_6 = arith.constant 0 : index
    %7 = vector.load %arg5[%c0_5, %c0_6] : memref<16x48xf32, #tpu.memory_space<vmem>>, vector<16x48xf32>
    %8 = arith.mulf %6, %7 : vector<16x48xf32>
    %9 = arith.addf %5, %8 : vector<16x48xf32>
    %10 = vector.extract_strided_slice %9 {offsets = [0, 32], sizes = [16, 8], strides = [1, 1]} : vector<16x48xf32> to vector<16x8xf32>
    %11 = vector.extract_strided_slice %9 {offsets = [0, 40], sizes = [16, 8], strides = [1, 1]} : vector<16x48xf32> to vector<16x8xf32>
    %12 = vector.extract_strided_slice %2 {offsets = [0, 48], sizes = [16, 8], strides = [1, 1]} : vector<16x112xf32> to vector<16x8xf32>
    %13 = vector.extract_strided_slice %2 {offsets = [0, 56], sizes = [16, 8], strides = [1, 1]} : vector<16x112xf32> to vector<16x8xf32>
    %14 = vector.extract_strided_slice %9 {offsets = [0, 0], sizes = [16, 8], strides = [1, 1]} : vector<16x48xf32> to vector<16x8xf32>
    %15 = vector.extract_strided_slice %9 {offsets = [0, 8], sizes = [16, 8], strides = [1, 1]} : vector<16x48xf32> to vector<16x8xf32>
    %16 = vector.extract_strided_slice %9 {offsets = [0, 16], sizes = [16, 8], strides = [1, 1]} : vector<16x48xf32> to vector<16x8xf32>
    %17 = vector.extract_strided_slice %9 {offsets = [0, 24], sizes = [16, 8], strides = [1, 1]} : vector<16x48xf32> to vector<16x8xf32>
    %18 = tpu.concatenate %14, %15, %16, %17 in 0 : vector<16x8xf32>, vector<16x8xf32>, vector<16x8xf32>, vector<16x8xf32> -> vector<64x8xf32>
    %19 = tpu.concatenate %10, %10, %11, %11 in 0 : vector<16x8xf32>, vector<16x8xf32>, vector<16x8xf32>, vector<16x8xf32> -> vector<64x8xf32>
    %20 = tpu.concatenate %12, %12, %13, %13 in 0 : vector<16x8xf32>, vector<16x8xf32>, vector<16x8xf32>, vector<16x8xf32> -> vector<64x8xf32>
    %cst_7 = arith.constant dense<0.000000e+00> : vector<64x64xf32>
    %21 = tpu.matmul %18, %19, %cst_7 {dimension_numbers = #tpu.dot_dimension_numbers<[1], [1], [0], [0], [0, 0, 1, 0], [], []>} : vector<64x8xf32>, vector<64x8xf32>, vector<64x64xf32> -> vector<64x64xf32>
    %c0_8 = arith.constant 0 : index
    %c0_9 = arith.constant 0 : index
    %22 = vector.load %arg6[%c0_8, %c0_9] : memref<64x64xf32, #tpu.memory_space<vmem>>, vector<64x64xf32>
    %23 = arith.addf %21, %22 : vector<64x64xf32>
    %cst_10 = arith.constant dense<0xFF800000> : vector<64xf32>
    %24 = vector.multi_reduction <maximumf>, %23, %cst_10 [1] : vector<64x64xf32> to vector<64xf32>
    %25 = vector.shape_cast %24 : vector<64xf32> to vector<64x1xf32>
    %26 = vector.broadcast %25 : vector<64x1xf32> to vector<64x64xf32>
    %27 = arith.subf %23, %26 : vector<64x64xf32>
    %28 = math.exp %27 : vector<64x64xf32>
    %cst_11 = arith.constant dense<0.000000e+00> : vector<64xf32>
    %29 = vector.multi_reduction <add>, %28, %cst_11 [1] : vector<64x64xf32> to vector<64xf32>
    %30 = vector.shape_cast %29 : vector<64xf32> to vector<64x1xf32>
    %31 = tpu.reciprocal %30 {approx = true} : vector<64x1xf32> -> vector<64x1xf32>
    %32 = vector.broadcast %31 : vector<64x1xf32> to vector<64x64xf32>
    %33 = arith.mulf %28, %32 : vector<64x64xf32>
    %cst_12 = arith.constant dense<0.000000e+00> : vector<64x8xf32>
    %34 = tpu.matmul %33, %20, %cst_12 {dimension_numbers = #tpu.dot_dimension_numbers<[1], [0], [0], [1], [0, 0, 1, 1], [], []>} : vector<64x64xf32>, vector<64x8xf32>, vector<64x8xf32> -> vector<64x8xf32>
    %35 = vector.extract_strided_slice %34 {offsets = [0, 0], sizes = [16, 8], strides = [1, 1]} : vector<64x8xf32> to vector<16x8xf32>
    %36 = vector.extract_strided_slice %34 {offsets = [16, 0], sizes = [16, 8], strides = [1, 1]} : vector<64x8xf32> to vector<16x8xf32>
    %37 = vector.extract_strided_slice %34 {offsets = [32, 0], sizes = [16, 8], strides = [1, 1]} : vector<64x8xf32> to vector<16x8xf32>
    %38 = vector.extract_strided_slice %34 {offsets = [48, 0], sizes = [16, 8], strides = [1, 1]} : vector<64x8xf32> to vector<16x8xf32>
    %39 = tpu.concatenate %35, %36, %37, %38 in 1 : vector<16x8xf32>, vector<16x8xf32>, vector<16x8xf32>, vector<16x8xf32> -> vector<16x32xf32>
    %40 = arith.truncf %39 : vector<16x32xf32> to vector<16x32xbf16>
    %c0_13 = arith.constant 0 : index
    %c0_14 = arith.constant 0 : index
    %41 = vector.load %arg3[%c0_13, %c0_14] : memref<32x32xbf16, #tpu.memory_space<vmem>>, vector<32x32xbf16>
    %cst_15 = arith.constant dense<0.000000e+00> : vector<16x32xf32>
    %42 = tpu.matmul %40, %41, %cst_15 {dimension_numbers = #tpu.dot_dimension_numbers<[1], [0], [0], [1], [0, 0, 1, 1], [], []>} : vector<16x32xbf16>, vector<32x32xbf16>, vector<16x32xf32> -> vector<16x32xf32>
    %c0_16 = arith.constant 0 : index
    %c0_17 = arith.constant 0 : index
    %43 = vector.load %arg7[%c0_16, %c0_17] : memref<16x32xf32, #tpu.memory_space<vmem>>, vector<16x32xf32>
    tpu.vector_store %arg7[%c0_16, %c0_17], %42 {strides = array<i32>} : memref<16x32xf32, #tpu.memory_space<vmem>>, vector<16x32xf32>,
    return
  }
  func.func @transform_0(%arg0: i32) -> (i32, i32) {
    %c0_i32 = arith.constant 0 : i32
    %c0_i32_0 = arith.constant 0 : i32
    %c0_i32_1 = arith.constant 0 : i32
    return %c0_i32, %c0_i32_0 : i32, i32
  }
  func.func @transform_1(%arg0: i32) -> (i32, i32) {
    %c0_i32 = arith.constant 0 : i32
    %c0_i32_0 = arith.constant 0 : i32
    %c0_i32_1 = arith.constant 0 : i32
    return %c0_i32, %c0_i32_0 : i32, i32
  }
  func.func @transform_2(%arg0: i32) -> (i32, i32) {
    %c0_i32 = arith.constant 0 : i32
    %c0_i32_0 = arith.constant 0 : i32
    %c0_i32_1 = arith.constant 0 : i32
    return %c0_i32, %c0_i32_0 : i32, i32
  }
  func.func @transform_3(%arg0: i32) -> (i32, i32) {
    %c0_i32 = arith.constant 0 : i32
    %c0_i32_0 = arith.constant 0 : i32
    %c0_i32_1 = arith.constant 0 : i32
    return %c0_i32, %c0_i32_0 : i32, i32
  }
  func.func @transform_4(%arg0: i32) -> (i32, i32) {
    %c0_i32 = arith.constant 0 : i32
    %c0_i32_0 = arith.constant 0 : i32
    %c0_i32_1 = arith.constant 0 : i32
    return %c0_i32, %c0_i32_0 : i32, i32
  }
  func.func @transform_5(%arg0: i32) -> (i32, i32) {
    %c0_i32 = arith.constant 0 : i32
    %c0_i32_0 = arith.constant 0 : i32
    %c0_i32_1 = arith.constant 0 : i32
    return %c0_i32, %c0_i32_0 : i32, i32
  }
  func.func @transform_6(%arg0: i32) -> (i32, i32) {
    %c0_i32 = arith.constant 0 : i32
    %c0_i32_0 = arith.constant 0 : i32
    %c0_i32_1 = arith.constant 0 : i32
    return %c0_i32, %c0_i32_0 : i32, i32
  }
}

</mosaic_0001>

<bundles_post_ra>
// kernel: tpu_custom_call.1
= control target key start
LH: loop header
LB: loop body
LE: loop exit
PB: predicated region body
PF: predicated region fallthrough
CT: control target
= control target key end

     0   :  { %11 = vsyncpa [#allocation3], 0  ;;  %s1052_s0 = inlined_call_operand.hbm [shape: bf16[16,32], index: 0, kind: input, shape index: {}]   ;;  %s1053_s1 = inlined_call_operand.hbm [shape: bf16[32,112], index: 1, kind: input, shape index: {}]   ;;  %s1054_s2 = inlined_call_operand.hbm [shape: bf16[32,32], index: 2, kind: input, shape index: {}]   ;;  %s1055_s3 = inlined_call_operand.hbm [shape: f32[16,48], index: 3, kind: input, shape index: {}]   ;;  %s1056_s4 = inlined_call_operand.hbm [shape: f32[16,48], index: 4, kind: input, shape index: {}]   ;;  %s1057_s5 = inlined_call_operand.hbm [shape: f32[64,64], index: 5, kind: input, shape index: {}]   ;;  %s1058_s6 = inlined_call_operand.hbm [shape: f32[16,32], index: 6, kind: output, shape index: {}]  }
   0x1   :  { %12 = vsyncpa [#allocation6], 0 }
   0x2   :  { %13 = vsyncpa [#allocation9], 0 }
   0x3   :  { %14 = vsyncpa [#allocation12], 0 }
   0x4   :  { %15 = vsyncpa [#allocation4], 0  ;;  %s33_s23 = sshll.u32 %s1053_s1, 4  ;;  %s869_s24 = smov [#allocation5]   ;;  %s34_s23 = int_to_ptr.hbm [resolvable:$true] %s33_s23 }
   0x5   :  { %s35_s25 = sshll.u32 %s869_s24, 4  ;;  %s59_s28 = sshll.u32 %s1055_s3, 4  ;;  %s36_s25 = int_to_ptr.vmem [resolvable:$true] %s35_s25  ;;  %s60_s28 = int_to_ptr.hbm [resolvable:$true] %s59_s28 }
   0x6   :  { %s870_s29 = smov 64   ;;  %s871_s30 = smov 4  }
   0x7   :  { %41 = dma.hbm_to_vmem [thread:$0]  %s34_s23, 256, %s36_s25, [#allocation6], %s870_s29, %s870_s29, %s871_s30  }
   0x8   :  { %s872_s7 = smov [#allocation8]   ;;  %s873_s9 = smov 128  }
   0x9   :  { %s61_s8 = sshll.u32 %s872_s7, 4  ;;  %s874_s10 = smov 8   ;;  %s62_s8 = int_to_ptr.vmem [resolvable:$true] %s61_s8 }
   0xa   :  { %67 = dma.hbm_to_vmem [thread:$0]  %s60_s28, 256, %s62_s8, [#allocation9], %s873_s9, %s873_s9, %s874_s10  }
   0xb   :  { %s20_s12 = sshll.u32 %s1052_s0, 4  ;;  %s875_s3 = smov [#allocation2]   ;;  %s21_s12 = int_to_ptr.hbm [resolvable:$true] %s20_s12 }
   0xc   :  { %s22_s13 = sshll.u32 %s875_s3, 4  ;;  %s46_s16 = sshll.u32 %s1054_s2, 4  ;;  %s23_s13 = int_to_ptr.vmem [resolvable:$true] %s22_s13  ;;  %s47_s16 = int_to_ptr.hbm [resolvable:$true] %s46_s16 }
   0xd   :  { %28 = dma.hbm_to_vmem [thread:$0]  %s21_s12, 128, %s23_s13, [#allocation3], %s870_s29, %s870_s29, %s871_s30  }
   0xe   :  { %s876_s17 = smov [#allocation7]   ;;  %s72_s21 = sshll.u32 %s1056_s4, 4  ;;  %s73_s21 = int_to_ptr.hbm [resolvable:$true] %s72_s21 }
   0xf   :  { %s48_s18 = sshll.u32 %s876_s17, 4  ;;  %s85_s23 = sshll.u32 %s1057_s5, 4  ;;  %s49_s18 = int_to_ptr.vmem [resolvable:$true] %s48_s18  ;;  %s86_s23 = int_to_ptr.hbm [resolvable:$true] %s85_s23 }
  0x10   :  { %54 = dma.hbm_to_vmem [thread:$0]  %s47_s16, 256, %s49_s18, [#allocation6], %s870_s29, %s870_s29, %s871_s30  }
  0x11   :  { %s877_s2 = smov [#allocation10]   ;;  %s878_s25 = smov [#allocation11]  }
  0x12   :  { %s74_s24 = sshll.u32 %s877_s2, 4  ;;  %s87_s26 = sshll.u32 %s878_s25, 4  ;;  %s75_s24 = int_to_ptr.vmem [resolvable:$true] %s74_s24  ;;  %s88_s26 = int_to_ptr.vmem [resolvable:$true] %s87_s26 }
  0x13   :  { %80 = dma.hbm_to_vmem [thread:$0]  %s73_s21, 256, %s75_s24, [#allocation9], %s873_s9, %s873_s9, %s874_s10  }
  0x14   :  { %93 = dma.hbm_to_vmem [thread:$0]  %s86_s23, 1024, %s88_s26, [#allocation12], %s873_s9, %s873_s9, %s874_s10  }
  0x15   :  { %859 = dma.done.wait [#allocation3], 128  }
  0x16   :  { %860 = vsyncadd [#allocation3], 4294967168 }
  0x17   :  { %861 = dma.done.wait [#allocation6], 512  }
  0x18   :  { %862 = vsyncadd [#allocation6], 4294966784 }
  0x19   :  { %863 = dma.done.wait [#allocation9], 512  }
  0x1a   :  { %864 = vsyncadd [#allocation9], 4294966784 }
  0x1b   :  { %865 = dma.done.wait [#allocation12], 1024  }
  0x1c   :  { %866 = vsyncadd [#allocation12], 4294966272  ;;  %v592_v0 = vld [vmem:[#allocation5 + $0x8] sm:$0xff]  ;;  %v165_v1 = vld [vmem:[#allocation10 + $0x8] sm:$0xff]  ;;  %vm142_vm0 = vcmask 261120   ;;  %s879_s4 = smov 120  }
  0x1d   :  { %152 = vmatpush.bf16.msra.mxu3 %v592_v0  ;;  %v591_v2 = vld [vmem:[#allocation5] sm:$0xff]  ;;  %170 = vrot.lane.b32.xlu0 %v165_v1, %s870_s29  ;;  %v590_v3 = vld [vmem:[#allocation2] sm:$0xff]  ;;  %v164_v4 = vld [vmem:[#allocation10] sm:$0xff]  ;;  %s880_s5 = smov 96   ;;  %s881_s27 = smov 112   ;;  %vm222_vm1 = vcmask 64512  }
  0x1e   :  { %v161_v11 = vld [vmem:[#allocation8 + $0x8] sm:$0xff]  ;;  %v160_v15 = vld [vmem:[#allocation8] sm:$0xff]  ;;  %s882_s28 = smov 104   ;;  %vm288_vm2 = vcmask 523264   ;;  %v208_v40 = vld [vmem:[#allocation11 + $0x10] sm:$0xff]  ;;  %s884_s30 = smov 16  }
  0x1f   :  { %v206_v30 = vld [vmem:[#allocation11] sm:$0xff]  ;;  %v207_v35 = vld [vmem:[#allocation11 + $0x8] sm:$0xff]  ;;  %v212_v41 = vld [vmem:[#allocation11 + $0x30] sm:$0xff]  ;;  %s885_s7 = smov 24   ;;  %vm480_vm3 = vcmask 130048   ;;  %vm483_vm4 = vcmask 195584  }
  0x20   :  { %v209_v48 = vld [vmem:[#allocation11 + $0x18] sm:$0xff]  ;;  %v210_v56 = vld [vmem:[#allocation11 + $0x20] sm:$0xff]  ;;  %v211_v60 = vld [vmem:[#allocation11 + $0x28] sm:$0xff]  ;;  %s886_s8 = smov [#allocation13]   ;;  %s528_s3 = sshll.u32 %s1058_s6, 4  ;;  %s529_s3 = int_to_ptr.hbm [resolvable:$true] %s528_s3 }
  0x21   :  { %153 = vmatpush.bf16.msra.mxu3 %v591_v2  ;;  %v213_v49 = vld [vmem:[#allocation11 + $0x38] sm:$0xff]  ;;  %s526_s1 = sshll.u32 %s886_s8, 4  ;;  %s527_s1 = int_to_ptr.vmem [resolvable:$true] %s526_s1 }
  0x24   :  { %556 = vmatmul.msk.bf16.vlgmr.msra.gmra.mxu3 %vm142_vm0, %v590_v3 }
  0x25   :  { %168 = vrot.lane.b32.xlu0 %v164_v4, %s870_s29 }
  0x8f   :  { %v171_v6 = vpop.permute.xlu0 %170 }
  0x97   :  { %v169_v9 = vpop.permute.xlu0 %168 }
  0xa7   :  { %v155_v5 = vpop.f32.mrf.mxu3 }
  0xa8   :  { %v174_v10 = vmul.f32 %v169_v9, %v155_v5  ;;  %v162_v16 = vmul.f32 %v160_v15, %v155_v5 }
  0xaf   :  { %v157_v7 = vpop.f32.mrf.mxu3 }
  0xb0   :  { %v175_v8 = vmul.f32 %v171_v6, %v157_v7  ;;  %v163_v12 = vmul.f32 %v161_v11, %v157_v7  ;;  %v960_v21 = vpack.i.bf16 %v155_v5, %v157_v7 }
  0xb2   :  { %180 = vrot.lane.b32.xlu1 %v175_v8, %s870_s29 }
  0xba   :  { %178 = vrot.lane.b32.xlu1 %v174_v10, %s870_s29  ;;  %s883_s29 = smov 80  }
 0x124   :  { %v181_v13 = vpop.permute.xlu1 %180 }
 0x125   :  { %v185_v14 = vadd.f32 %v181_v13, %v163_v12 }
 0x127   :  { %190 = vrot.lane.b32.xlu2 %v185_v14, %s879_s4 }
 0x12c   :  { %v179_v17 = vpop.permute.xlu1 %178 }
 0x12d   :  { %v184_v18 = vadd.f32 %v179_v17, %v162_v16 }
 0x12f   :  { %188 = vrot.lane.b32.xlu2 %v184_v18, %s879_s4 }
 0x137   :  { %216 = vrot.lane.b32.xlu2 %v185_v14, %s880_s5 }
 0x13f   :  { %194 = vrot.lane.b32.xlu2 %v185_v14, %s881_s27 }
 0x181   :  { %v191_v19 = vpop.permute.xlu2 %190 }
 0x182   :  { %220 = vrot.lane.b32.xlu0 %v191_v19, %s880_s5 }
 0x189   :  { %v189_v20 = vpop.permute.xlu2 %188 }
 0x18a   :  { %214 = vrot.lane.b32.xlu0 %v184_v18, %s880_s5  ;;  %218 = vrot.lane.b32.xlu1 %v189_v20, %s880_s5 }
 0x191   :  { %v217_v24 = vpop.permute.xlu2 %216 }
 0x192   :  { %196 = vrot.lane.b32.xlu0 %v184_v18, %s882_s28  ;;  %192 = vrot.lane.b32.xlu1 %v184_v18, %s881_s27 }
 0x199   :  { %v195_v27 = vpop.permute.xlu2 %194 }
 0x19a   :  { %630 = vrot.lane.b32.xlu0 %v960_v21, %s879_s4  ;;  %198 = vrot.lane.b32.xlu1 %v185_v14, %s882_s28 }
 0x1f4   :  { %v221_v22 = vpop.permute.xlu0 %220 }
 0x1f5   :  { %557 = vmatpush.xpose.msk.msra.mxu0 %vm222_vm1, %v221_v22  ;;  %595 = vmatpush.xpose.msk.msra.mxu1 %vm222_vm1, %v221_v22 }
 0x1fc   :  { %v219_v23 = vpop.permute.xlu1 %218  ;;  %v215_v25 = vpop.permute.xlu0 %214 }
 0x1fd   :  { %558 = vmatpush.xpose.msk.msra.mxu0 %vm222_vm1, %v219_v23  ;;  %596 = vmatpush.xpose.msk.msra.mxu1 %vm222_vm1, %v219_v23 }
 0x201   :  { %559 = vmatpush.xpose.msk.msra.mxu0 %vm222_vm1, %v221_v22  ;;  %597 = vmatpush.xpose.msk.msra.mxu1 %vm222_vm1, %v221_v22 }
 0x204   :  { %v193_v26 = vpop.permute.xlu1 %192  ;;  %v197_v28 = vpop.permute.xlu0 %196 }
 0x205   :  { %560 = vmatpush.xpose.msk.msra.mxu0 %vm222_vm1, %v219_v23  ;;  %598 = vmatpush.xpose.msk.msra.mxu1 %vm222_vm1, %v219_v23 }
 0x209   :  { %561 = vmatpush.xpose.msk.msra.mxu0 %vm222_vm1, %v217_v24  ;;  %599 = vmatpush.xpose.msk.msra.mxu1 %vm222_vm1, %v217_v24 }
 0x20c   :  { %v199_v29 = vpop.permute.xlu1 %198  ;;  %v631_v59 = vpop.permute.xlu0 %630 }
 0x20d   :  { %562 = vmatpush.xpose.msk.msra.mxu0 %vm222_vm1, %v215_v25  ;;  %600 = vmatpush.xpose.msk.msra.mxu1 %vm222_vm1, %v215_v25 }
 0x211   :  { %563 = vmatpush.xpose.msk.msra.mxu0 %vm222_vm1, %v217_v24  ;;  %601 = vmatpush.xpose.msk.msra.mxu1 %vm222_vm1, %v217_v24 }
 0x215   :  { %564 = vmatpush.xpose.msk.msra.mxu0 %vm222_vm1, %v215_v25  ;;  %602 = vmatpush.xpose.msk.msra.mxu1 %vm222_vm1, %v215_v25 }
 0x218   :  { %565 = vmatmul.msk.f32.vlgmr.msra.gmra.mxu0 %vm222_vm1, %v184_v18  ;;  %569 = vmatmul.msk.f32.vlgmr.msra.gmra.mxu1 %vm222_vm1, %v193_v26 }
 0x220   :  { %566 = vmatmul.msk.f32.gmra.mxu0 %vm222_vm1, %v185_v14  ;;  %570 = vmatmul.msk.f32.gmra.mxu1 %vm222_vm1, %v195_v27 }
 0x228   :  { %567 = vmatmul.msk.f32.gmra.mxu0 %vm222_vm1, %v189_v20  ;;  %571 = vmatmul.msk.f32.gmra.mxu1 %vm222_vm1, %v197_v28 }
 0x230   :  { %568 = vmatmul.msk.f32.gmra.mxu0 %vm222_vm1, %v191_v19  ;;  %572 = vmatmul.msk.f32.gmra.mxu1 %vm222_vm1, %v199_v29 }
 0x295   :  { %v264_v31 = vpop.f32.mrf.mxu0  ;;  %v276_v32 = vpop.f32.mrf.mxu1 }
 0x296   :  { %v265_v33 = vadd.f32 %v264_v31, %v206_v30  ;;  %v277_v57 = vadd.f32 %v276_v32, %v210_v56 }
 0x298   :  { %v289_v34 = vsel %vm288_vm2, %v265_v33, -inf  ;;  %v301_v58 = vsel %vm288_vm2, %v277_v57, -inf }
 0x299   :  { %290 = vmax.xlane.f32.xlu2 %v289_v34 }
 0x29d   :  { %v267_v36 = vpop.f32.mrf.mxu0  ;;  %v279_v37 = vpop.f32.mrf.mxu1 }
 0x29e   :  { %v268_v38 = vadd.f32 %v267_v36, %v207_v35  ;;  %v280_v61 = vadd.f32 %v279_v37, %v211_v60 }
 0x2a0   :  { %v292_v39 = vsel %vm288_vm2, %v268_v38, -inf  ;;  %v304_v62 = vsel %vm288_vm2, %v280_v61, -inf }
 0x2a1   :  { %293 = vmax.xlane.f32.xlu1 %v292_v39 }
 0x2a5   :  { %v270_v42 = vpop.f32.mrf.mxu0  ;;  %v282_v43 = vpop.f32.mrf.mxu1 }
 0x2a6   :  { %v271_v44 = vadd.f32 %v270_v42, %v208_v40  ;;  %v283_v45 = vadd.f32 %v282_v43, %v212_v41 }
 0x2a8   :  { %v295_v46 = vsel %vm288_vm2, %v271_v44, -inf  ;;  %v307_v47 = vsel %vm288_vm2, %v283_v45, -inf }
 0x2a9   :  { %296 = vmax.xlane.f32.xlu0 %v295_v46  ;;  %308 = vmax.xlane.f32.xlu1 %v307_v47 }
 0x2ad   :  { %v273_v50 = vpop.f32.mrf.mxu0  ;;  %v285_v51 = vpop.f32.mrf.mxu1 }
 0x2ae   :  { %v274_v52 = vadd.f32 %v273_v50, %v209_v48  ;;  %v991_v53 = vadd.f32 %v285_v51, %v213_v49 }
 0x2b0   :  { %v298_v54 = vsel %vm288_vm2, %v274_v52, -inf  ;;  %v310_v55 = vsel %vm288_vm2, %v991_v53, -inf }
 0x2b1   :  { %299 = vmax.xlane.f32.xlu2 %v298_v54  ;;  %311 = vmax.xlane.f32.xlu0 %v310_v55 }
 0x2b9   :  { %302 = vmax.xlane.f32.xlu2 %v301_v58 }
 0x2c1   :  { %305 = vmax.xlane.f32.xlu2 %v304_v62 }
 0x2c2   :  { %635 = vrot.lane.b32.xlu1 %v631_v59, %s883_s29 }
 0x2c5   :  { %640 = vrot.lane.b32.xlu0 %v960_v21, %s883_s29 }
 0x30c   :  { %v291_v63 = vpop.xlane.xlu2 %290 }
 0x30d   :  { %v313_v0 = vsub.f32 %v265_v33, %v291_v63 }
 0x30f   :  { %v321_v1 = vmul.f32 1.442695, %v313_v0 }
 0x311   :  { %659 = vpow2.f32 %v321_v1 }
 0x314   :  { %v294_v2 = vpop.xlane.xlu1 %293 }
 0x315   :  { %v314_v3 = vsub.f32 %v268_v38, %v294_v2 }
 0x317   :  { %v999_v4 = vpop.eup %659  ;;  %v323_v5 = vmul.f32 1.442695, %v314_v3 }
 0x318   :  { %v337_v6 = vsel %vm288_vm2, %v999_v4, 0.0 }
 0x319   :  { %661 = vpow2.f32 %v323_v5  ;;  %338 = vadd.xlane.f32.xlu2 %v337_v6 }
 0x31c   :  { %v297_v7 = vpop.xlane.xlu0 %296  ;;  %v309_v8 = vpop.xlane.xlu1 %308 }
 0x31d   :  { %v315_v9 = vsub.f32 %v271_v44, %v297_v7  ;;  %v319_v12 = vsub.f32 %v283_v45, %v309_v8 }
 0x31f   :  { %v1003_v10 = vpop.eup %661  ;;  %v325_v11 = vmul.f32 1.442695, %v315_v9  ;;  %v333_v14 = vmul.f32 1.442695, %v319_v12 }
 0x320   :  { %v340_v13 = vsel %vm288_vm2, %v1003_v10, 0.0 }
 0x321   :  { %663 = vpow2.f32 %v325_v11  ;;  %341 = vadd.xlane.f32.xlu2 %v340_v13 }
 0x322   :  { %665 = vpow2.f32 %v333_v14 }
 0x324   :  { %v300_v15 = vpop.xlane.xlu2 %299  ;;  %v312_v27 = vpop.xlane.xlu0 %311 }
 0x325   :  { %v316_v16 = vsub.f32 %v274_v52, %v300_v15  ;;  %v320_v33 = vsub.f32 %v991_v53, %v312_v27 }
 0x327   :  { %v1007_v17 = vpop.eup %663  ;;  %v327_v18 = vmul.f32 1.442695, %v316_v16  ;;  %v335_v38 = vmul.f32 1.442695, %v320_v33  ;;  %v594_v16 = vld [vmem:[#allocation7 + $0x8] sm:$0xff] }
 0x328   :  { %v343_v19 = vsel %vm288_vm2, %v1007_v17, 0.0  ;;  %v1011_v21 = vpop.eup %665 }
 0x329   :  { %667 = vpow2.f32 %v327_v18  ;;  %344 = vadd.xlane.f32.xlu2 %v343_v19  ;;  %v355_v26 = vsel %vm288_vm2, %v1011_v21, 0.0 }
 0x32c   :  { %v303_v20 = vpop.xlane.xlu2 %302 }
 0x32d   :  { %v317_v22 = vsub.f32 %v277_v57, %v303_v20 }
 0x32f   :  { %v1013_v23 = vpop.eup %667  ;;  %v329_v24 = vmul.f32 1.442695, %v317_v22 }
 0x330   :  { %v346_v25 = vsel %vm288_vm2, %v1013_v23, 0.0 }
 0x331   :  { %669 = vpow2.f32 %v329_v24  ;;  %347 = vadd.xlane.f32.xlu1 %v346_v25  ;;  %356 = vadd.xlane.f32.xlu2 %v355_v26 }
 0x334   :  { %v306_v28 = vpop.xlane.xlu2 %305  ;;  %v636_v29 = vpop.permute.xlu1 %635 }
 0x335   :  { %v318_v30 = vsub.f32 %v280_v61, %v306_v28  ;;  %v637_v31 = vunpack.i.l.bf16 %v636_v29  ;;  %v638_v35 = vunpack.i.h.bf16 %v636_v29 }
 0x337   :  { %v1019_v32 = vpop.eup %669  ;;  %v331_v34 = vmul.f32 1.442695, %v318_v30  ;;  %421 = vmatpush.msra.mxu2 %v637_v31  ;;  %603 = vmatpush.msrb.mxu3 %v637_v31  ;;  %v641_v37 = vpop.permute.xlu0 %640 }
 0x338   :  { %v349_v36 = vsel %vm288_vm2, %v1019_v32, 0.0  ;;  %v642_v39 = vunpack.i.l.bf16 %v641_v37  ;;  %v643_v41 = vunpack.i.h.bf16 %v641_v37 }
 0x339   :  { %671 = vpow2.f32 %v331_v34  ;;  %350 = vadd.xlane.f32.xlu0 %v349_v36  ;;  %422 = vmatpush.msra.mxu2 %v638_v35 }
 0x33a   :  { %604 = vmatpush.msrb.mxu3 %v638_v35  ;;  %673 = vpow2.f32 %v335_v38 }
 0x33b   :  { %423 = vmatpush.msra.mxu2 %v637_v31 }
 0x33c   :  { %605 = vmatpush.msrb.mxu3 %v637_v31 }
 0x33d   :  { %424 = vmatpush.msra.mxu2 %v638_v35 }
 0x33e   :  { %606 = vmatpush.msrb.mxu3 %v638_v35 }
 0x33f   :  { %v672_v40 = vpop.eup %671  ;;  %425 = vmatpush.msra.mxu2 %v642_v39 }
 0x340   :  { %607 = vmatpush.msrb.mxu3 %v642_v39  ;;  %v352_v42 = vsel %vm288_vm2, %v672_v40, 0.0  ;;  %v674_v43 = vpop.eup %673 }
 0x341   :  { %353 = vadd.xlane.f32.xlu2 %v352_v42  ;;  %426 = vmatpush.msra.mxu2 %v643_v41  ;;  %v358_v44 = vsel %vm288_vm2, %v674_v43, 0.0 }
 0x342   :  { %608 = vmatpush.msrb.mxu3 %v643_v41 }
 0x343   :  { %427 = vmatpush.msra.mxu2 %v642_v39 }
 0x344   :  { %609 = vmatpush.msrb.mxu3 %v642_v39 }
 0x345   :  { %428 = vmatpush.msra.mxu2 %v643_v41 }
 0x346   :  { %610 = vmatpush.msrb.mxu3 %v643_v41 }
 0x348   :  { %512 = vmatpush.bf16.msra.mxu3 %v594_v16 }
 0x349   :  { %359 = vadd.xlane.f32.xlu2 %v358_v44 }
 0x38c   :  { %v339_v45 = vpop.xlane.xlu2 %338 }
 0x38d   :  { %675 = vrcp.f32 %v339_v45 }
 0x393   :  { %v676_v46 = vpop.eup %675 }
 0x394   :  { %v342_v47 = vpop.xlane.xlu2 %341  ;;  %v369_v48 = vmul.f32 %v676_v46, %v999_v4 }
 0x395   :  { %677 = vrcp.f32 %v342_v47 }
 0x396   :  { %573 = vmatmul.msk.f32.vlgmr.msra.gmra.mxu2 %vm288_vm2, %v369_v48 }
 0x39b   :  { %v678_v49 = vpop.eup %677 }
 0x39c   :  { %v345_v50 = vpop.xlane.xlu2 %344  ;;  %v370_v51 = vmul.f32 %v678_v49, %v1003_v10 }
 0x39d   :  { %679 = vrcp.f32 %v345_v50 }
 0x39e   :  { %574 = vmatmul.msk.f32.gmra.mxu2 %vm288_vm2, %v370_v51 }
 0x3a3   :  { %v680_v52 = vpop.eup %679 }
 0x3a4   :  { %v357_v53 = vpop.xlane.xlu2 %356  ;;  %v348_v54 = vpop.xlane.xlu1 %347  ;;  %v371_v55 = vmul.f32 %v680_v52, %v1007_v17  ;;  %v593_v17 = vld [vmem:[#allocation7] sm:$0xff] }
 0x3a5   :  { %681 = vrcp.f32 %v357_v53  ;;  %513 = vmatpush.bf16.msra.mxu3 %v593_v17 }
 0x3a6   :  { %683 = vrcp.f32 %v348_v54  ;;  %575 = vmatmul.msk.f32.gmra.mxu2 %vm288_vm2, %v371_v55 }
 0x3ab   :  { %v682_v56 = vpop.eup %681 }
 0x3ac   :  { %v684_v57 = vpop.eup %683  ;;  %v351_v58 = vpop.xlane.xlu0 %350  ;;  %v375_v59 = vmul.f32 %v682_v56, %v1011_v21 }
 0x3ad   :  { %685 = vrcp.f32 %v351_v58  ;;  %v372_v60 = vmul.f32 %v684_v57, %v1013_v23 }
 0x3ae   :  { %579 = vmatmul.msk.f32.vlgmr.msrb.gmra.mxu3 %vm288_vm2, %v375_v59 }
 0x3af   :  { %576 = vmatmul.msk.f32.gmra.mxu2 %vm288_vm2, %v372_v60 }
 0x3b3   :  { %v686_v61 = vpop.eup %685 }
 0x3b4   :  { %v354_v62 = vpop.xlane.xlu2 %353  ;;  %v373_v63 = vmul.f32 %v686_v61, %v1019_v32 }
 0x3b5   :  { %687 = vrcp.f32 %v354_v62 }
 0x3b7   :  { %577 = vmatmul.msk.f32.gmra.mxu2 %vm288_vm2, %v373_v63 }
 0x3bb   :  { %v688_v0 = vpop.eup %687 }
 0x3bc   :  { %v360_v1 = vpop.xlane.xlu2 %359  ;;  %v374_v2 = vmul.f32 %v688_v0, %v672_v40 }
 0x3bd   :  { %689 = vrcp.f32 %v360_v1 }
 0x3bf   :  { %578 = vmatmul.msk.f32.gmra.mxu2 %vm288_vm2, %v374_v2 }
 0x3c3   :  { %v690_v3 = vpop.eup %689 }
 0x3c4   :  { %v376_v4 = vmul.f32 %v690_v3, %v674_v43 }
 0x3c6   :  { %580 = vmatmul.msk.f32.gmra.mxu3 %vm288_vm2, %v376_v4 }
 0x419   :  { %v430_v5 = vpop.f32.mrf.mxu2 }
 0x421   :  { %v433_v6 = vpop.f32.mrf.mxu2 }
 0x429   :  { %v436_v7 = vpop.f32.mrf.mxu2 }
 0x431   :  { %v448_v11 = vpop.f32.mrf.mxu3 }
 0x432   :  { %v439_v8 = vpop.f32.mrf.mxu2 }
 0x433   :  { %v644_v9 = vpack.i.bf16 %v439_v8, %v436_v7 }
 0x435   :  { %645 = vrot.lane.b32.xlu2 %v644_v9, %s874_s10 }
 0x43a   :  { %v442_v10 = vpop.f32.mrf.mxu2 }
 0x442   :  { %v445_v12 = vpop.f32.mrf.mxu2 }
 0x443   :  { %v649_v13 = vpack.i.bf16 %v445_v12, %v442_v10 }
 0x445   :  { %650 = vrot.lane.b32.xlu1 %v649_v13, %s884_s30 }
 0x449   :  { %v451_v14 = vpop.f32.mrf.mxu3 }
 0x44a   :  { %v654_v15 = vpack.i.bf16 %v451_v14, %v448_v11 }
 0x44c   :  { %655 = vrot.lane.b32.xlu0 %v654_v15, %s885_s7 }
 0x48f   :  { %v646_v18 = vpop.permute.xlu2 %645 }
 0x490   :  { %v648_v20 = vunpack.i.h.bf16 %v646_v18  ;;  %v647_v21 = vunpack.i.l.bf16 %v646_v18 }
 0x492   :  { %v479_v25 = vsel %vm222_vm1, %v433_v6, %v648_v20  ;;  %v478_v26 = vsel %vm222_vm1, %v430_v5, %v647_v21 }
 0x4b7   :  { %v651_v19 = vpop.permute.xlu1 %650 }
 0x4b8   :  { %v653_v22 = vunpack.i.h.bf16 %v651_v19  ;;  %v652_v23 = vunpack.i.l.bf16 %v651_v19 }
 0x4ba   :  { %v482_v29 = vsel %vm480_vm3, %v479_v25, %v653_v22  ;;  %v481_v30 = vsel %vm480_vm3, %v478_v26, %v652_v23 }
 0x4be   :  { %v656_v24 = vpop.permute.xlu0 %655 }
 0x4bf   :  { %v658_v27 = vunpack.i.h.bf16 %v656_v24  ;;  %v657_v28 = vunpack.i.l.bf16 %v656_v24 }
 0x4c1   :  { %v484_v31 = vsel %vm483_vm4, %v481_v30, %v657_v28  ;;  %v485_v32 = vsel %vm483_vm4, %v482_v29, %v658_v27 }
 0x4c2   :  { %v486_v33 = vpack.c.bf16 %v485_v32, %v484_v31 }
 0x4c4   :  { %589 = vmatmul.msk.bf16.vlgmr.msra.gmra.mxu3 %vm142_vm0, %v486_v33 }
 0x547   :  { %v515_v34 = vpop.f32.mrf.mxu3 }
 0x548   :  { %520 = vst.msk [vmem:[#allocation13] sm:$0xff] %vm142_vm0, %v515_v34 }
 0x54f   :  { %v517_v35 = vpop.f32.mrf.mxu3 }
 0x550   :  { %521 = vst.msk [vmem:[#allocation13 + $0x8] sm:$0xff] %vm142_vm0, %v517_v35 }
 0x551   :  { %534 = dma.vmem_to_hbm [thread:$0]  %s527_s1, 256, %s529_s3, [#allocation4], %s873_s9, %s873_s9, %s874_s10  }
 0x552   :  { %867 = dma.done.wait [#allocation4], 256  }
 0x553   :  { %868 = vsyncadd [#allocation4], 4294967040 }
 0x554   :  { %539 = vsyncpa [#allocation3], 1 }
 0x555   :  { %540 = vsyncpa [#allocation6], 1 }
 0x556   :  { %541 = vsyncpa [#allocation9], 1 }
 0x557   :  { %542 = vsyncpa [#allocation12], 1 }
 0x558   :  { %543 = vsyncpa [#allocation4], 1 }

</bundles_post_ra>
